<compile_context>
chip_gen: v6e
topology: v6e:2x2x1
jax: 0.10.0
libtpu: 0.0.40
codegen_flags: <defaults>
</compile_context>

<pallas_src>
import functools

import jax
import jax.numpy as jnp
from jax.experimental import pallas as pl
from jax.experimental.pallas import tpu as pltpu

BN_EPS = 1e-5


def _residual_conv_kernel(patches_ref, xflat_ref, wmat_ref, bconv_ref,
                          gamma_ref, beta_ref, wlin_ref, blin_ref, o_ref,
                          *, n_bn, inv_hw):
    """patches: (B, K*K*Cin, P)  xflat: (B, Cin, H*W)  wmat: (Cout, K*K*Cin)
    bconv/gamma/beta/blin: (Cout, 1)  wlin: (Cout, Cin)  out: (B, Cout, P)."""
    B = o_ref.shape[0]

    wmat = wmat_ref[...]                       # (Cout, KKC)
    bconv = bconv_ref[...]                     # (Cout, 1)

    # ---- conv (valid, stride handled in wrapper) as im2col MXU matmuls.
    convs = []
    for b in range(B):
        c = jnp.dot(wmat, patches_ref[b],      # (Cout, KKC) @ (KKC, P)
                    preferred_element_type=jnp.float32)
        convs.append(c + bconv)                # (Cout, P), P on lanes

    # ---- BatchNorm2d (training mode): fused single-pass batch stats per channel.
    s1 = sum(jnp.sum(c, axis=1, keepdims=True) for c in convs)        # (Cout, 1)
    s2 = sum(jnp.sum(c * c, axis=1, keepdims=True) for c in convs)    # (Cout, 1)
    inv_n = 1.0 / n_bn
    mean = s1 * inv_n
    var = jnp.maximum(s2 * inv_n - mean * mean, 0.0)                  # biased var
    inv_std = jax.lax.rsqrt(var + BN_EPS)
    scale = inv_std * gamma_ref[...]            # hoisted: (Cout, 1)
    shift = beta_ref[...] - mean * scale        # hoisted: (Cout, 1)

    wlin = wlin_ref[...]                        # (Cout, Cin)
    blin = blin_ref[...]                        # (Cout, 1)

    # ---- BN apply + ReLU + residual (spatial mean -> Linear), bulk 2D stores.
    for b in range(B):
        r = jnp.sum(xflat_ref[b], axis=-1, keepdims=True) * inv_hw    # (Cin, 1)
        lin = jnp.dot(wlin, r, preferred_element_type=jnp.float32) + blin  # (Cout, 1)
        act = jnp.maximum(convs[b] * scale + shift, 0.0)              # (Cout, P)
        o_ref[b] = (act + lin).astype(o_ref.dtype)


def residual_conv_layer(x_nchw, params, *, kernel_size=3, stride=1):
    """Forward pass of ResidualConvLayer. Input/output are NCHW like PyTorch."""
    K = kernel_size
    x = x_nchw.astype(jnp.float32)
    B, Cin, H, W = x.shape
    conv_w = params["conv_w"]                   # (Cout, Cin, K, K)
    Cout = conv_w.shape[0]
    Ho = (H - K) // stride + 1
    Wo = (W - K) // stride + 1
    P = Ho * Wo

    # im2col (wrapper-side layout plumbing): patches[b, (ki*K+kj)*Cin+ci, ho*Wo+wo]
    taps = jnp.stack(
        [x[:, :, ki:ki + (Ho - 1) * stride + 1:stride,
              kj:kj + (Wo - 1) * stride + 1:stride]
         for ki in range(K) for kj in range(K)], axis=1)       # (B, K*K, Cin, Ho, Wo)
    patches = taps.reshape(B, K * K * Cin, P)

    x_flat = x.reshape(B, Cin, H * W)                          # for residual mean

    # weights, oriented so the kernel needs no in-kernel relayouts
    wmat = jnp.transpose(conv_w, (0, 2, 3, 1)).reshape(Cout, K * K * Cin)
    bconv = params["conv_b"].reshape(Cout, 1)
    gamma = params["bn_w"].reshape(Cout, 1)
    beta = params["bn_b"].reshape(Cout, 1)
    wlin = params["lin_w"]                                     # (Cout, Cin)
    blin = params["lin_b"].reshape(Cout, 1)

    kernel = functools.partial(_residual_conv_kernel,
                               n_bn=float(B * P), inv_hw=1.0 / float(H * W))
    vmem_specs = [pl.BlockSpec(memory_space=pltpu.MemorySpace.VMEM)
                  for _ in range(8)]
    out = pl.pallas_call(
        kernel,
        out_shape=jax.ShapeDtypeStruct((B, Cout, P), jnp.float32),
        in_specs=vmem_specs,
        out_specs=pl.BlockSpec(memory_space=pltpu.MemorySpace.VMEM),
        compiler_params=pltpu.CompilerParams(vmem_limit_bytes=32 * 1024 * 1024),
    )(patches, x_flat, wmat, bconv, gamma, beta, wlin, blin)

    return out.reshape(B, Cout, Ho, Wo)          # free reshape, already NCHW order


def init_params(key, cin, cout, k):
    """Deterministic parameter init (PyTorch-style fan-in uniform; BN=identity)."""
    k1, k2, k3, k4 = jax.random.split(key, 4)
    bc = 1.0 / float(cin * k * k) ** 0.5
    bl = 1.0 / float(cin) ** 0.5
    return {
        "conv_w": jax.random.uniform(k1, (cout, cin, k, k), jnp.float32, -bc, bc),
        "conv_b": jax.random.uniform(k2, (cout,), jnp.float32, -bc, bc),
        "bn_w": jnp.ones((cout,), jnp.float32),
        "bn_b": jnp.zeros((cout,), jnp.float32),
        "lin_w": jax.random.uniform(k3, (cout, cin), jnp.float32, -bl, bl),
        "lin_b": jax.random.uniform(k4, (cout,), jnp.float32, -bl, bl),
    }


def reference(x_nchw, params):
    """Pure-JAX reference mirroring the PyTorch forward (training-mode BN)."""
    conv = jax.lax.conv_general_dilated(
        x_nchw, params["conv_w"], window_strides=(1, 1), padding="VALID",
        dimension_numbers=("NCHW", "OIHW", "NCHW"),
        precision=jax.lax.Precision.HIGHEST)
    conv = conv + params["conv_b"][None, :, None, None]
    mean = jnp.mean(conv, axis=(0, 2, 3), keepdims=True)
    var = jnp.mean((conv - mean) ** 2, axis=(0, 2, 3), keepdims=True)
    bn = (conv - mean) / jnp.sqrt(var + BN_EPS)
    bn = bn * params["bn_w"][None, :, None, None] + params["bn_b"][None, :, None, None]
    act = jnp.maximum(bn, 0.0)
    residual = jnp.mean(x_nchw, axis=(-2, -1))           # (B, Cin)
    lin = residual @ params["lin_w"].T + params["lin_b"]
    return act + lin[:, :, None, None]


if __name__ == "__main__":
    key = jax.random.PRNGKey(0)
    kp, kx = jax.random.split(key)
    B, Cin, Cout, H, W, K = 2, 4, 8, 16, 16, 3

    params = init_params(kp, Cin, Cout, K)
    x = jax.random.normal(kx, (B, Cin, H, W), jnp.float32)

    out = residual_conv_layer(x, params, kernel_size=K, stride=1)
    out = jax.block_until_ready(out)

    ref = reference(x, params)
    assert out.shape == (B, Cout, H - K + 1, W - K + 1), out.shape
    err = float(jnp.max(jnp.abs(out - ref)))
    if err > 2e-3:
        raise AssertionError(f"mismatch vs reference: max abs err {err}")
    print("KERNEL_OK")
</pallas_src>

<mosaic_0001>
module attributes {stable_mosaic.version = 11 : i64} {
  func.func @_residual_conv_kernel(%arg0: memref<2x36x196xf32, #tpu.memory_space<vmem>>, %arg1: memref<2x4x256xf32, #tpu.memory_space<vmem>>, %arg2: memref<8x36xf32, #tpu.memory_space<vmem>>, %arg3: memref<8x1xf32, #tpu.memory_space<vmem>>, %arg4: memref<8x1xf32, #tpu.memory_space<vmem>>, %arg5: memref<8x1xf32, #tpu.memory_space<vmem>>, %arg6: memref<8x4xf32, #tpu.memory_space<vmem>>, %arg7: memref<8x1xf32, #tpu.memory_space<vmem>>, %arg8: memref<2x8x196xf32, #tpu.memory_space<vmem>>) attributes {dimension_semantics = [], scalar_prefetch = 0 : i64, scratch_operands = 0 : i64, tpu.core_type = #tpu.core_type<tc>} {
    %c0 = arith.constant 0 : index
    %c0_0 = arith.constant 0 : index
    %0 = vector.load %arg2[%c0, %c0_0] : memref<8x36xf32, #tpu.memory_space<vmem>>, vector<8x36xf32>
    %c0_1 = arith.constant 0 : index
    %c0_2 = arith.constant 0 : index
    %1 = vector.load %arg3[%c0_1, %c0_2] : memref<8x1xf32, #tpu.memory_space<vmem>>, vector<8x1xf32>
    %c0_3 = arith.constant 0 : index
    %c0_4 = arith.constant 0 : index
    %c0_5 = arith.constant 0 : index
    %2 = vector.load %arg0[%c0_3, %c0_4, %c0_5] : memref<2x36x196xf32, #tpu.memory_space<vmem>>, vector<1x36x196xf32>
    %3 = vector.shape_cast %2 : vector<1x36x196xf32> to vector<36x196xf32>
    %cst = arith.constant dense<0.000000e+00> : vector<8x196xf32>
    %4 = tpu.matmul %0, %3, %cst {dimension_numbers = #tpu.dot_dimension_numbers<[1], [0], [0], [1], [0, 0, 1, 1], [], []>} : vector<8x36xf32>, vector<36x196xf32>, vector<8x196xf32> -> vector<8x196xf32>
    %5 = vector.broadcast %1 : vector<8x1xf32> to vector<8x196xf32>
    %6 = arith.addf %4, %5 : vector<8x196xf32>
    %c1 = arith.constant 1 : index
    %c0_6 = arith.constant 0 : index
    %c0_7 = arith.constant 0 : index
    %7 = vector.load %arg0[%c1, %c0_6, %c0_7] : memref<2x36x196xf32, #tpu.memory_space<vmem>>, vector<1x36x196xf32>
    %8 = vector.shape_cast %7 : vector<1x36x196xf32> to vector<36x196xf32>
    %cst_8 = arith.constant dense<0.000000e+00> : vector<8x196xf32>
    %9 = tpu.matmul %0, %8, %cst_8 {dimension_numbers = #tpu.dot_dimension_numbers<[1], [0], [0], [1], [0, 0, 1, 1], [], []>} : vector<8x36xf32>, vector<36x196xf32>, vector<8x196xf32> -> vector<8x196xf32>
    %10 = vector.broadcast %1 : vector<8x1xf32> to vector<8x196xf32>
    %11 = arith.addf %9, %10 : vector<8x196xf32>
    %cst_9 = arith.constant dense<0.000000e+00> : vector<8xf32>
    %12 = vector.multi_reduction <add>, %6, %cst_9 [1] : vector<8x196xf32> to vector<8xf32>
    %13 = vector.shape_cast %12 : vector<8xf32> to vector<8x1xf32>
    %cst_10 = arith.constant 0.000000e+00 : f32
    %14 = vector.broadcast %cst_10 : f32 to vector<8x1xf32>
    %15 = arith.addf %14, %13 : vector<8x1xf32>
    %cst_11 = arith.constant dense<0.000000e+00> : vector<8xf32>
    %16 = vector.multi_reduction <add>, %11, %cst_11 [1] : vector<8x196xf32> to vector<8xf32>
    %17 = vector.shape_cast %16 : vector<8xf32> to vector<8x1xf32>
    %18 = arith.addf %15, %17 : vector<8x1xf32>
    %19 = arith.mulf %6, %6 : vector<8x196xf32>
    %cst_12 = arith.constant dense<0.000000e+00> : vector<8xf32>
    %20 = vector.multi_reduction <add>, %19, %cst_12 [1] : vector<8x196xf32> to vector<8xf32>
    %21 = vector.shape_cast %20 : vector<8xf32> to vector<8x1xf32>
    %cst_13 = arith.constant 0.000000e+00 : f32
    %22 = vector.broadcast %cst_13 : f32 to vector<8x1xf32>
    %23 = arith.addf %22, %21 : vector<8x1xf32>
    %24 = arith.mulf %11, %11 : vector<8x196xf32>
    %cst_14 = arith.constant dense<0.000000e+00> : vector<8xf32>
    %25 = vector.multi_reduction <add>, %24, %cst_14 [1] : vector<8x196xf32> to vector<8xf32>
    %26 = vector.shape_cast %25 : vector<8xf32> to vector<8x1xf32>
    %27 = arith.addf %23, %26 : vector<8x1xf32>
    %cst_15 = arith.constant 0.00255102036 : f32
    %28 = vector.broadcast %cst_15 : f32 to vector<8x1xf32>
    %29 = arith.mulf %18, %28 : vector<8x1xf32>
    %cst_16 = arith.constant 0.00255102036 : f32
    %30 = vector.broadcast %cst_16 : f32 to vector<8x1xf32>
    %31 = arith.mulf %27, %30 : vector<8x1xf32>
    %32 = arith.mulf %29, %29 : vector<8x1xf32>
    %33 = arith.subf %31, %32 : vector<8x1xf32>
    %cst_17 = arith.constant 0.000000e+00 : f32
    %34 = vector.broadcast %cst_17 : f32 to vector<8x1xf32>
    %35 = arith.maximumf %33, %34 : vector<8x1xf32>
    %cst_18 = arith.constant 9.99999974E-6 : f32
    %36 = vector.broadcast %cst_18 : f32 to vector<8x1xf32>
    %37 = arith.addf %35, %36 : vector<8x1xf32>
    %38 = math.rsqrt %37 : vector<8x1xf32>
    %c0_19 = arith.constant 0 : index
    %c0_20 = arith.constant 0 : index
    %39 = vector.load %arg4[%c0_19, %c0_20] : memref<8x1xf32, #tpu.memory_space<vmem>>, vector<8x1xf32>
    %40 = arith.mulf %38, %39 : vector<8x1xf32>
    %c0_21 = arith.constant 0 : index
    %c0_22 = arith.constant 0 : index
    %41 = vector.load %arg5[%c0_21, %c0_22] : memref<8x1xf32, #tpu.memory_space<vmem>>, vector<8x1xf32>
    %42 = arith.mulf %29, %40 : vector<8x1xf32>
    %43 = arith.subf %41, %42 : vector<8x1xf32>
    %c0_23 = arith.constant 0 : index
    %c0_24 = arith.constant 0 : index
    %44 = vector.load %arg6[%c0_23, %c0_24] : memref<8x4xf32, #tpu.memory_space<vmem>>, vector<8x4xf32>
    %c0_25 = arith.constant 0 : index
    %c0_26 = arith.constant 0 : index
    %45 = vector.load %arg7[%c0_25, %c0_26] : memref<8x1xf32, #tpu.memory_space<vmem>>, vector<8x1xf32>
    %c0_27 = arith.constant 0 : index
    %c0_28 = arith.constant 0 : index
    %c0_29 = arith.constant 0 : index
    %46 = vector.load %arg1[%c0_27, %c0_28, %c0_29] : memref<2x4x256xf32, #tpu.memory_space<vmem>>, vector<1x4x256xf32>
    %47 = vector.shape_cast %46 : vector<1x4x256xf32> to vector<4x256xf32>
    %cst_30 = arith.constant dense<0.000000e+00> : vector<4xf32>
    %48 = vector.multi_reduction <add>, %47, %cst_30 [1] : vector<4x256xf32> to vector<4xf32>
    %49 = vector.shape_cast %48 : vector<4xf32> to vector<4x1xf32>
    %cst_31 = arith.constant 3.906250e-03 : f32
    %50 = vector.broadcast %cst_31 : f32 to vector<4x1xf32>
    %51 = arith.mulf %49, %50 : vector<4x1xf32>
    %cst_32 = arith.constant dense<0.000000e+00> : vector<8x1xf32>
    %52 = tpu.matmul %44, %51, %cst_32 {dimension_numbers = #tpu.dot_dimension_numbers<[1], [0], [0], [1], [0, 0, 1, 1], [], []>} : vector<8x4xf32>, vector<4x1xf32>, vector<8x1xf32> -> vector<8x1xf32>
    %53 = arith.addf %52, %45 : vector<8x1xf32>
    %54 = vector.broadcast %40 : vector<8x1xf32> to vector<8x196xf32>
    %55 = arith.mulf %6, %54 : vector<8x196xf32>
    %56 = vector.broadcast %43 : vector<8x1xf32> to vector<8x196xf32>
    %57 = arith.addf %55, %56 : vector<8x196xf32>
    %cst_33 = arith.constant 0.000000e+00 : f32
    %58 = vector.broadcast %cst_33 : f32 to vector<8x196xf32>
    %59 = arith.maximumf %57, %58 : vector<8x196xf32>
    %60 = vector.broadcast %53 : vector<8x1xf32> to vector<8x196xf32>
    %61 = arith.addf %59, %60 : vector<8x196xf32>
    %c0_34 = arith.constant 0 : index
    %c0_35 = arith.constant 0 : index
    %c0_36 = arith.constant 0 : index
    %62 = vector.load %arg8[%c0_34, %c0_35, %c0_36] : memref<2x8x196xf32, #tpu.memory_space<vmem>>, vector<1x8x196xf32>
    %63 = vector.shape_cast %62 : vector<1x8x196xf32> to vector<8x196xf32>
    %64 = vector.shape_cast %61 : vector<8x196xf32> to vector<1x8x196xf32>
    tpu.vector_store %arg8[%c0_34, %c0_35, %c0_36], %64 {strides = array<i32>} : memref<2x8x196xf32, #tpu.memory_space<vmem>>, vector<1x8x196xf32>,
    %c1_37 = arith.constant 1 : index
    %c0_38 = arith.constant 0 : index
    %c0_39 = arith.constant 0 : index
    %65 = vector.load %arg1[%c1_37, %c0_38, %c0_39] : memref<2x4x256xf32, #tpu.memory_space<vmem>>, vector<1x4x256xf32>
    %66 = vector.shape_cast %65 : vector<1x4x256xf32> to vector<4x256xf32>
    %cst_40 = arith.constant dense<0.000000e+00> : vector<4xf32>
    %67 = vector.multi_reduction <add>, %66, %cst_40 [1] : vector<4x256xf32> to vector<4xf32>
    %68 = vector.shape_cast %67 : vector<4xf32> to vector<4x1xf32>
    %cst_41 = arith.constant 3.906250e-03 : f32
    %69 = vector.broadcast %cst_41 : f32 to vector<4x1xf32>
    %70 = arith.mulf %68, %69 : vector<4x1xf32>
    %cst_42 = arith.constant dense<0.000000e+00> : vector<8x1xf32>
    %71 = tpu.matmul %44, %70, %cst_42 {dimension_numbers = #tpu.dot_dimension_numbers<[1], [0], [0], [1], [0, 0, 1, 1], [], []>} : vector<8x4xf32>, vector<4x1xf32>, vector<8x1xf32> -> vector<8x1xf32>
    %72 = arith.addf %71, %45 : vector<8x1xf32>
    %73 = vector.broadcast %40 : vector<8x1xf32> to vector<8x196xf32>
    %74 = arith.mulf %11, %73 : vector<8x196xf32>
    %75 = vector.broadcast %43 : vector<8x1xf32> to vector<8x196xf32>
    %76 = arith.addf %74, %75 : vector<8x196xf32>
    %cst_43 = arith.constant 0.000000e+00 : f32
    %77 = vector.broadcast %cst_43 : f32 to vector<8x196xf32>
    %78 = arith.maximumf %76, %77 : vector<8x196xf32>
    %79 = vector.broadcast %72 : vector<8x1xf32> to vector<8x196xf32>
    %80 = arith.addf %78, %79 : vector<8x196xf32>
    %c1_44 = arith.constant 1 : index
    %c0_45 = arith.constant 0 : index
    %c0_46 = arith.constant 0 : index
    %81 = vector.load %arg8[%c1_44, %c0_45, %c0_46] : memref<2x8x196xf32, #tpu.memory_space<vmem>>, vector<1x8x196xf32>
    %82 = vector.shape_cast %81 : vector<1x8x196xf32> to vector<8x196xf32>
    %83 = vector.shape_cast %80 : vector<8x196xf32> to vector<1x8x196xf32>
    tpu.vector_store %arg8[%c1_44, %c0_45, %c0_46], %83 {strides = array<i32>} : memref<2x8x196xf32, #tpu.memory_space<vmem>>, vector<1x8x196xf32>,
    return
  }
}

</mosaic_0001>

<bundles_post_ra>
// kernel: tpu_custom_call.1
= control target key start
LH: loop header
LB: loop body
LE: loop exit
PB: predicated region body
PF: predicated region fallthrough
CT: control target
= control target key end

     0   :  { %vm51_vm0 = vcmask 1043456   ;;  %s707_s0 = inlined_call_operand.vmem [shape: f32[2,36,196], index: 0, kind: input, shape index: {}]   ;;  %s708_s1 = inlined_call_operand.vmem [shape: f32[2,4,256], index: 1, kind: input, shape index: {}]   ;;  %s709_s2 = inlined_call_operand.vmem [shape: f32[8,36], index: 2, kind: input, shape index: {}]   ;;  %s710_s3 = inlined_call_operand.vmem [shape: f32[8,1], index: 3, kind: input, shape index: {}]   ;;  %s711_s4 = inlined_call_operand.vmem [shape: f32[8,1], index: 4, kind: input, shape index: {}]   ;;  %s712_s5 = inlined_call_operand.vmem [shape: f32[8,1], index: 5, kind: input, shape index: {}]   ;;  %s713_s6 = inlined_call_operand.vmem [shape: f32[8,4], index: 6, kind: input, shape index: {}]   ;;  %s714_s7 = inlined_call_operand.vmem [shape: f32[8,1], index: 7, kind: input, shape index: {}]   ;;  %s715_s8 = inlined_call_operand.hbm [shape: f32[2,8,196], index: 8, kind: output, shape index: {}]  }
   0x1   :  { %v41_v0 = vld [vmem:[%s707_s0 + $0x48] sm:$0xf]  ;;  %v496_v1 = vld [vmem:[%s707_s0 + $0x98] sm:$0xf]  ;;  %v40_v3 = vld [vmem:[%s707_s0 + $0x40] sm:$0xf] }
   0x2   :  { %v39_v2 = vld [vmem:[%s707_s0 + $0x38] sm:$0xff]  ;;  %484 = vmatprep.subr.msk.mxu0 %vm51_vm0, %v41_v0  ;;  %497 = vmatprep.subr.msk.mxu1 %vm51_vm0, %v496_v1  ;;  %v495_v4 = vld [vmem:[%s707_s0 + $0x90] sm:$0xf]  ;;  %v494_v5 = vld [vmem:[%s707_s0 + $0x88] sm:$0xff] }
   0x3   :  { %485 = vmatpush1.msk.msra.mxu0 %vm51_vm0, %v40_v3  ;;  %498 = vmatpush1.msk.msra.mxu1 %vm51_vm0, %v495_v4  ;;  %v38_v6 = vld [vmem:[%s707_s0 + $0x30] sm:$0xff]  ;;  %v493_v7 = vld [vmem:[%s707_s0 + $0x80] sm:$0xff]  ;;  %v37_v8 = vld [vmem:[%s707_s0 + $0x28] sm:$0xff] }
   0x4   :  { %82 = vmatprep.subr.mxu0 %v39_v2  ;;  %170 = vmatprep.subr.mxu1 %v494_v5  ;;  %v492_v9 = vld [vmem:[%s707_s0 + $0x78] sm:$0xff]  ;;  %v256_v10 = vld [vmem:[%s708_s1] sm:$0xff]  ;;  %v491_v14 = vld [vmem:[%s707_s0 + $0x70] sm:$0xff] }
   0x5   :  { %v36_v11 = vld [vmem:[%s707_s0 + $0x20] sm:$0xff]  ;;  %83 = vmatpush1.msra.mxu0 %v38_v6  ;;  %171 = vmatpush1.msra.mxu1 %v493_v7  ;;  %v258_v12 = vcombine.high %v256_v10, %v256_v10  ;;  %v260_v13 = vsel %vm51_vm0, %v256_v10, 0.0  ;;  %v35_v15 = vld [vmem:[%s707_s0 + $0x18] sm:$0xff]  ;;  %v490_v16 = vld [vmem:[%s707_s0 + $0x68] sm:$0xff] }
   0x6   :  { %84 = vmatprep.subr.mxu0 %v37_v8  ;;  %172 = vmatprep.subr.mxu1 %v492_v9  ;;  %v34_v17 = vld [vmem:[%s707_s0 + $0x10] sm:$0xff]  ;;  %v489_v18 = vld [vmem:[%s707_s0 + $0x60] sm:$0xff]  ;;  %v33_v20 = vld [vmem:[%s707_s0 + $0x8] sm:$0xff] }
   0x7   :  { %v261_v19 = vsel %vm51_vm0, %v258_v12, 0.0  ;;  %85 = vmatpush1.msra.mxu0 %v36_v11  ;;  %173 = vmatpush1.msra.mxu1 %v491_v14  ;;  %v488_v22 = vld [vmem:[%s707_s0 + $0x58] sm:$0xff]  ;;  %v32_v23 = vld [vmem:[%s707_s0] sm:$0xff]  ;;  %v502_v24 = vld [vmem:[%s708_s1 + $0x8] sm:$0xff] }
   0x8   :  { %v262_v21 = vadd.f32 %v261_v19, %v260_v13  ;;  %86 = vmatprep.subr.mxu0 %v35_v15  ;;  %174 = vmatprep.subr.mxu1 %v490_v16  ;;  %v487_v25 = vld [vmem:[%s707_s0 + $0x50] sm:$0xff]  ;;  %v371_v26 = vcombine.high %v502_v24, %v502_v24  ;;  %v373_v27 = vsel %vm51_vm0, %v502_v24, 0.0 }
   0x9   :  { %87 = vmatpush1.msra.mxu0 %v34_v17  ;;  %175 = vmatpush1.msra.mxu1 %v489_v18 }
   0xa   :  { %13 = vsyncpa [#allocation3], 0  ;;  %263 = vadd.xlane.f32.xlu0 %v262_v21  ;;  %88 = vmatprep.subr.mxu0 %v33_v20  ;;  %v30_v28 = vld [vmem:[%s709_s2] sm:$0xff]  ;;  %vm47_vm1 = vcmask 293888   ;;  %v374_v29 = vsel %vm51_vm0, %v371_v26, 0.0  ;;  %v553_v30 = vmov 0.0  }
   0xb   :  { %176 = vmatprep.subr.mxu1 %v488_v22  ;;  %89 = vmatpush1.msra.mxu0 %v32_v23  ;;  %v375_v31 = vadd.f32 %v374_v29, %v373_v27  ;;  %v31_v32 = vld [vmem:[%s710_s3] sm:$0xff]  ;;  %v554_v33 = vmov 0   ;;  %vm555_vm2 = vmmov 0   ;;  %vm266_vm3 = vcmask 31744  }
   0xc   :  { %122 = vmatprep.mubr.f32.mxu0 %v553_v30  ;;  %177 = vmatpush1.msra.mxu1 %v487_v25  ;;  %v254_v36 = vld [vmem:[%s713_s6] sm:$0xff]  ;;  %vm217_vm4 = vcmask 556032  }
   0xd   :  { %210 = vmatprep.mubr.f32.mxu1 %v553_v30  ;;  %486 = vmatmul.mubr.msk.f32.vlgmr.msra.gmra.mxu0 %vm47_vm1, %v30_v28  ;;  %v255_v60 = vld [vmem:[%s714_s7] sm:$0xff] }
   0xe   :  { %499 = vmatmul.mubr.msk.f32.vlgmr.msra.gmra.mxu1 %vm47_vm1, %v30_v28  ;;  %376 = vadd.xlane.f32.xlu0 %v375_v31  ;;  %v249_v14 = vld [vmem:[%s711_s4] sm:$0xff]  ;;  %s556_s4 = smov [#allocation2]  }
   0xf   :  { %525 = vset.pattern.permute.xlu1 %v554_v33  ;;  %509 = vmatprep.subr.mxu0 %v553_v30  ;;  %v251_v17 = vld [vmem:[%s712_s5] sm:$0xff]  ;;  %s473_s11 = sshll.u32 %s556_s4, 4  ;;  %s474_s11 = int_to_ptr.vmem [resolvable:$true] %s473_s11 }
  0x10   :  { %44 = vperm.xlu1 %525, %v31_v32   ;;  %514 = vmatprep.subr.mxu1 %v553_v30  ;;  %s531_s5 = scalar_lea.vmem %s474_s11, 512  ;;  %p536_p1 = scmp.lt.s32.totalorder %s474_s11, %s474_s11 }
  0x11   :  { %526 = vset.pattern.permute.xlu0 %v554_v33  ;;  %511 = vmatprep.mubr.msk.f32.mxu0 %vm555_vm2, %v553_v30  ;;  %p532_p0 = scmp.ne.s32.totalorder %s474_s11, %s531_s5  ;;  %p537_p2 = scmp.lt.s32.totalorder %s531_s5, %s531_s5 }
  0x12   :  { %516 = vmatprep.mubr.msk.f32.mxu1 %vm555_vm2, %v553_v30 }
  0x13   :  { %p538_p3 = por %p537_p2, %p536_p1 }
  0x15   :  { %p539_p4 = pnand %p538_p3, %p532_p0 }
  0x8b   :  { %v45_v40 = vpop.permute.xlu1 %44 }
  0x93   :  { %v264_v34 = vpop.xlane.xlu0 %263 }
  0x94   :  { %v265_v35 = vmul.f32 0.00390625, %v264_v34 }
  0x96   :  { %510 = vmatpush3.msk.msra.mxu0 %vm51_vm0, %v265_v35 }
  0x97   :  { %512 = vmatmul.mubr.msk.f32.vlgmr.msra.gmra.mxu0 %vm266_vm3, %v254_v36  ;;  %v377_v37 = vpop.xlane.xlu0 %376 }
  0x98   :  { %v378_v38 = vmul.f32 0.00390625, %v377_v37 }
  0x9a   :  { %515 = vmatpush3.msk.msra.mxu1 %vm51_vm0, %v378_v38 }
  0x9b   :  { %517 = vmatmul.mubr.msk.f32.vlgmr.msra.gmra.mxu1 %vm266_vm3, %v254_v36 }
  0xcd   :  { %v124_v39 = vpop.f32.mrf.mxu0 }
  0xce   :  { %v212_v41 = vpop.f32.mrf.mxu1  ;;  %v125_v42 = vadd.f32 %v124_v39, %v45_v40 }
  0xcf   :  { %v126_v43 = vpop.f32.mrf.mxu0  ;;  %v213_v47 = vadd.f32 %v212_v41, %v45_v40 }
  0xd0   :  { %v127_v44 = vadd.f32 %v126_v43, %v45_v40  ;;  %v214_v45 = vpop.f32.mrf.mxu1  ;;  %v228_v53 = vmul.f32 %v125_v42, %v125_v42 }
  0xd1   :  { %v215_v46 = vadd.f32 %v214_v45, %v45_v40  ;;  %v235_v58 = vmul.f32 %v213_v47, %v213_v47 }
  0xd2   :  { %v218_v48 = vsel %vm217_vm4, %v127_v44, 0.0  ;;  %v229_v49 = vmul.f32 %v127_v44, %v127_v44 }
  0xd3   :  { %v223_v50 = vsel %vm217_vm4, %v215_v46, 0.0  ;;  %v219_v51 = vadd.f32 %v218_v48, %v125_v42  ;;  %v236_v55 = vmul.f32 %v215_v46, %v215_v46 }
  0xd4   :  { %v224_v52 = vadd.f32 %v223_v50, %v213_v47  ;;  %v230_v54 = vsel %vm217_vm4, %v229_v49, 0.0 }
  0xd5   :  { %220 = vadd.xlane.f32.xlu1 %v219_v51  ;;  %v231_v56 = vadd.f32 %v230_v54, %v228_v53  ;;  %v237_v57 = vsel %vm217_vm4, %v236_v55, 0.0 }
  0xd6   :  { %225 = vadd.xlane.f32.xlu0 %v224_v52  ;;  %v238_v59 = vadd.f32 %v237_v57, %v235_v58 }
  0xda   :  { %232 = vadd.xlane.f32.xlu0 %v231_v56 }
  0xde   :  { %239 = vadd.xlane.f32.xlu0 %v238_v59 }
 0x157   :  { %v339_v61 = vpop.f32.mrf.mxu0 }
 0x158   :  { %v340_v62 = vadd.f32 %v339_v61, %v255_v60 }
 0x159   :  { %v513_v63 = vpop.f32.mrf.mxu0 }
 0x15a   :  { %361 = vperm.xlu1 %525, %v340_v62  }
 0x15b   :  { %v448_v0 = vpop.f32.mrf.mxu1 }
 0x15c   :  { %v449_v20 = vadd.f32 %v448_v0, %v255_v60 }
 0x15d   :  { %v518_v1 = vpop.f32.mrf.mxu1 }
 0x15e   :  { %v221_v3 = vpop.xlane.xlu1 %220 }
 0x15f   :  { %v226_v2 = vpop.xlane.xlu0 %225 }
 0x160   :  { %v227_v4 = vadd.f32 %v226_v2, %v221_v3 }
 0x162   :  { %v242_v6 = vmul.f32 0.0025510204, %v227_v4 }
 0x163   :  { %v233_v5 = vpop.xlane.xlu0 %232 }
 0x164   :  { %v244_v9 = vmul.f32 %v242_v6, %v242_v6 }
 0x167   :  { %v240_v7 = vpop.xlane.xlu0 %239 }
 0x168   :  { %v241_v8 = vadd.f32 %v240_v7, %v233_v5 }
 0x16a   :  { %v243_v10 = vmul.f32 0.0025510204, %v241_v8 }
 0x16c   :  { %v245_v11 = vsub.f32 %v243_v10, %v244_v9 }
 0x16e   :  { %v246_v12 = vmax.f32 %v245_v11, 0.0 }
 0x170   :  { %v247_v13 = vadd.f32 1e-05, %v246_v12 }
 0x172   :  { %529 = vrsqrt.f32 %v247_v13 }
 0x17f   :  { %v530_v15 = vpop.eup %529 }
 0x180   :  { %v250_v16 = vmul.f32 %v530_v15, %v249_v14 }
 0x182   :  { %345 = vperm.xlu0 %526, %v250_v16   ;;  %v252_v18 = vmul.f32 %v250_v16, %v242_v6 }
 0x184   :  { %v253_v19 = vsub.f32 %v251_v17, %v252_v18 }
 0x186   :  { %352 = vperm.xlu1 %525, %v253_v19  }
 0x18a   :  { %460 = vperm.xlu1 %525, %v449_v20  }
 0x1d5   :  { %v362_v21 = vpop.permute.xlu1 %361 }
 0x1fd   :  { %v346_v22 = vpop.permute.xlu0 %345 }
 0x1fe   :  { %v348_v23 = vmul.f32 %v346_v22, %v125_v42  ;;  %v349_v24 = vmul.f32 %v346_v22, %v127_v44  ;;  %v452_v25 = vmul.f32 %v346_v22, %v213_v47  ;;  %v453_v26 = vmul.f32 %v346_v22, %v215_v46 }
 0x201   :  { %v353_v27 = vpop.permute.xlu1 %352 }
 0x202   :  { %v355_v28 = vadd.f32 %v353_v27, %v348_v23  ;;  %v356_v29 = vadd.f32 %v353_v27, %v349_v24  ;;  %v454_v30 = vadd.f32 %v452_v25, %v353_v27  ;;  %v455_v31 = vadd.f32 %v453_v26, %v353_v27 }
 0x204   :  { %v357_v32 = vmax.f32 %v355_v28, 0.0  ;;  %v358_v33 = vmax.f32 %v356_v29, 0.0  ;;  %v456_v34 = vmax.f32 %v454_v30, 0.0  ;;  %v457_v35 = vmax.f32 %v455_v31, 0.0 }
 0x205   :  { %v461_v36 = vpop.permute.xlu1 %460 }
 0x206   :  { %v364_v37 = vadd.f32 %v362_v21, %v357_v32  ;;  %v365_v38 = vadd.f32 %v362_v21, %v358_v33  ;;  %v463_v39 = vadd.f32 %v461_v36, %v456_v34  ;;  %v464_v40 = vadd.f32 %v461_v36, %v457_v35 }
 0x208   :  { %366 = vst [vmem:[#allocation2] sm:$0xff] %v364_v37  ;;  %367 = vst.msk [vmem:[#allocation2 + $0x8] sm:$0xff] %vm217_vm4, %v365_v38 }
 0x209   :  { %466 = vst [vmem:[#allocation2 + $0x10] sm:$0xff] %v463_v39  ;;  %467 = vst.msk [vmem:[#allocation2 + $0x18] sm:$0xff] %vm217_vm4, %v464_v40 }
 0x20a   :  { %542 = shalt.err (!%p539_p4)
}
 0x20b   :  { %s557_s12 = smov 256   ;;  %s558_s13 = smov 16  }
 0x20c   :  { %479 = dma.vmem_to_hbm [thread:$0]  %s474_s11, 512, %s715_s8, [#allocation3], %s557_s12, %s557_s12, %s558_s13  }
 0x20d   :  { %551 = dma.done.wait [#allocation3], 512  }
 0x20e   :  { %552 = vsyncadd [#allocation3], 4294966784 }
 0x20f   :  { %483 = vsyncpa [#allocation3], 1 }

</bundles_post_ra>
